<compile_context>
chip_gen: v7x
topology: tpu7x:2x2x1
jax: 0.10.0
libtpu: 0.0.40
codegen_flags: <defaults>
</compile_context>

<pallas_src>
import functools

import jax
import jax.numpy as jnp
from jax.experimental import pallas as pl
from jax.experimental.pallas import tpu as pltpu


def _round_up(x: int, m: int) -> int:
    return ((x + m - 1) // m) * m


def _dbn_fused_kernel(x_ref, w0_ref, b0_ref, w1_ref, b1_ref, w2_ref, b2_ref, o_ref):
    """Fused 3-layer MLP on one batch tile: relu(relu(x@W0+b0)@W1+b1)@W2+b2.

    All matmuls run with bf16 operands (native single-pass MXU) and f32
    accumulation; bias adds and ReLUs stay in f32 on the VPU.
    """
    x = x_ref[...].astype(w0_ref.dtype)  # cast tile in VMEM (cheap VPU op)
    # Layer 0 (RBM 0): relu(x @ W0 + b0)
    h = jnp.dot(x, w0_ref[...], preferred_element_type=jnp.float32)
    h = jnp.maximum(h + b0_ref[...], 0.0)
    # Layer 1 (RBM 1): relu(h @ W1 + b1)
    h = jnp.dot(h.astype(w1_ref.dtype), w1_ref[...],
                preferred_element_type=jnp.float32)
    h = jnp.maximum(h + b1_ref[...], 0.0)
    # Final fc: h @ W2 + b2 (no ReLU)
    out = jnp.dot(h.astype(w2_ref.dtype), w2_ref[...],
                  preferred_element_type=jnp.float32)
    o_ref[...] = (out + b2_ref[...]).astype(o_ref.dtype)


def prepare_dbn_params(params, *, weight_dtype=jnp.bfloat16):
    """One-time weight prep (hoisted out of the per-forward path).

    params: [(w0,b0),(w1,b1),(w2,b2)] with w stored as (in_features, out_features).

    Output feature dims are zero-padded to multiples of 128 (exact math; padded
    columns are sliced off later). The first layer's input dim is NOT padded so
    the activation never needs a padded HBM copy. Weights are cast to
    `weight_dtype` (bf16 by default) once; biases stay f32 (added to the f32
    accumulator).
    """
    (w0, b0), (w1, b1), (w2, b2) = params
    K0, H0 = w0.shape
    H1 = w1.shape[1]
    NC = w2.shape[1]
    assert w1.shape[0] == H0 and w2.shape[0] == H1

    H0p = _round_up(H0, 128)
    H1p = _round_up(H1, 128)
    NCp = _round_up(max(NC, 128), 128)

    w0p = jnp.pad(w0, ((0, 0), (0, H0p - H0))).astype(weight_dtype)
    b0p = jnp.pad(b0, (0, H0p - H0)).astype(jnp.float32).reshape(1, H0p)
    w1p = jnp.pad(w1, ((0, H0p - H0), (0, H1p - H1))).astype(weight_dtype)
    b1p = jnp.pad(b1, (0, H1p - H1)).astype(jnp.float32).reshape(1, H1p)
    w2p = jnp.pad(w2, ((0, H1p - H1), (0, NCp - NC))).astype(weight_dtype)
    b2p = jnp.pad(b2, (0, NCp - NC)).astype(jnp.float32).reshape(1, NCp)
    return (w0p, b0p, w1p, b1p, w2p, b2p)


def _choose_batch_tile(B: int, block_batch: int) -> int:
    """Rows per grid step.

    * multiple of 8 (sublane) and <= block_batch
    * >= 2 (ideally 4) grid steps when the batch is big enough, so v7x's two
      TensorCores both get work via the "parallel" batch axis
    * <8 rows of padding waste per tile (TM = round_up(cdiv(B, n_tiles), 8))
    """
    if B <= 8:
        return B  # single tile equal to the full batch dim; no padding at all
    n_tiles = max(pl.cdiv(B, block_batch), min(4, B // 8))
    return min(block_batch, _round_up(pl.cdiv(B, n_tiles), 8))


def dbn_forward_pallas(x, padded_params, *, num_classes: int, block_batch: int = 512):
    """Forward pass. `padded_params` must come from prepare_dbn_params()."""
    w0p, b0p, w1p, b1p, w2p, b2p = padded_params

    B = x.shape[0]
    x2d = x.reshape(B, -1)  # == x.view(B, -1); reshape of contiguous array is free
    if x2d.dtype != jnp.float32:
        x2d = x2d.astype(jnp.float32)

    K0 = x2d.shape[1]
    H0p = w0p.shape[1]
    H1p = w1p.shape[1]
    NCp = w2p.shape[1]
    assert w0p.shape[0] == K0, (w0p.shape, K0)

    TM = _choose_batch_tile(B, block_batch)
    Bp = _round_up(B, TM)
    # Only the batch is (possibly) padded; the feature dim keeps its native
    # width so no K-padded copy of x ever hits HBM.
    xp = x2d if Bp == B else jnp.pad(x2d, ((0, Bp - B), (0, 0)))

    grid = (Bp // TM,)

    bytes_weights = sum(int(a.size) * a.dtype.itemsize
                        for a in (w0p, b0p, w1p, b1p, w2p, b2p))
    cost = pl.CostEstimate(
        flops=2 * Bp * (K0 * H0p + H0p * H1p + H1p * NCp),
        transcendentals=0,
        bytes_accessed=int(xp.size) * 4 + bytes_weights + Bp * NCp * 4,
    )

    out_padded = pl.pallas_call(
        _dbn_fused_kernel,
        out_shape=jax.ShapeDtypeStruct((Bp, NCp), jnp.float32),
        grid=grid,
        in_specs=[
            # Activation tile walks the batch; Pallas double-buffers it.
            pl.BlockSpec((TM, K0), lambda i: (i, 0)),
            # Weights / biases: constant index_map -> DMA'd once, VMEM-resident.
            pl.BlockSpec((K0, H0p), lambda i: (0, 0)),
            pl.BlockSpec((1, H0p), lambda i: (0, 0)),
            pl.BlockSpec((H0p, H1p), lambda i: (0, 0)),
            pl.BlockSpec((1, H1p), lambda i: (0, 0)),
            pl.BlockSpec((H1p, NCp), lambda i: (0, 0)),
            pl.BlockSpec((1, NCp), lambda i: (0, 0)),
        ],
        out_specs=pl.BlockSpec((TM, NCp), lambda i: (i, 0)),
        compiler_params=pltpu.CompilerParams(
            # Batch tiles are independent -> shard across TCs on v7x.
            dimension_semantics=("parallel",),
            # <10 MiB actually used even at TM=512; 32 MiB is safe on
            # v5e/v6e (128 MiB VMEM) and v7x (64 MiB/TC).
            vmem_limit_bytes=32 * 1024 * 1024,
        ),
        cost_estimate=cost,
    )(xp, w0p, b0p, w1p, b1p, w2p, b2p)

    # Strip batch padding and the lane-padded class columns.
    return out_padded[:B, :num_classes]


def init_linear_params(key, in_features, out_features):
    """Mirror torch.nn.Linear default init (uniform +-1/sqrt(fan_in)).

    Weight stored as (in_features, out_features) so the kernel computes x @ W.
    """
    kw, kb = jax.random.split(key)
    bound = 1.0 / jnp.sqrt(jnp.float32(in_features))
    w = jax.random.uniform(
        kw, (in_features, out_features), jnp.float32, minval=-bound, maxval=bound
    )
    b = jax.random.uniform(
        kb, (out_features,), jnp.float32, minval=-bound, maxval=bound
    )
    return w, b


def dbn_reference(x, params):
    """Pure-JAX f32 reference matching the PyTorch forward."""
    B = x.shape[0]
    h = x.reshape(B, -1)
    n = len(params)
    for i, (w, b) in enumerate(params):
        h = h @ w + b
        if i < n - 1:
            h = jnp.maximum(h, 0.0)
    return h


if __name__ == "__main__":
    # Small, self-consistent shapes:
    #   max_sequence_length = 8 -> input_dim = 100 * 8 = 800
    #   hidden_dims = [512, 256], num_classes = 2, batch = 2
    batch = 2
    max_sequence_length = 8
    embed = 100
    input_dim = embed * max_sequence_length
    hidden_dims = [512, 256]
    num_classes = 2

    root = jax.random.PRNGKey(0)
    k_x, k0, k1, k2 = jax.random.split(root, 4)

    x = jax.random.normal(k_x, (batch, embed, max_sequence_length), jnp.float32)

    dims = [input_dim] + hidden_dims + [num_classes]
    params = []
    for i, k in enumerate([k0, k1, k2]):
        params.append(init_linear_params(k, dims[i], dims[i + 1]))

    # One-time param prep (pad + cast to bf16), hoisted out of the forward.
    prepped = prepare_dbn_params(params, weight_dtype=jnp.bfloat16)

    fwd = jax.jit(functools.partial(
        dbn_forward_pallas, num_classes=num_classes, block_batch=512))
    out = fwd(x, prepped)
    out = jax.block_until_ready(out)

    assert out.shape == (batch, num_classes), out.shape
    assert out.dtype == jnp.float32

    ref = jax.block_until_ready(dbn_reference(x, params))
    # bf16 MXU operands (K=800 contraction) vs f32 reference: loosened tolerance.
    max_err = float(jnp.max(jnp.abs(out - ref)))
    assert max_err < 5e-2, f"mismatch vs reference, max abs err = {max_err}"

    print("KERNEL_OK")
</pallas_src>

<mosaic_0001>
module attributes {stable_mosaic.version = 11 : i64} {
  func.func @_dbn_fused_kernel(%arg0: i32, %arg1: memref<2x800xf32, #tpu.memory_space<vmem>>, %arg2: memref<800x512xbf16, #tpu.memory_space<vmem>>, %arg3: memref<1x512xf32, #tpu.memory_space<vmem>>, %arg4: memref<512x256xbf16, #tpu.memory_space<vmem>>, %arg5: memref<1x256xf32, #tpu.memory_space<vmem>>, %arg6: memref<256x128xbf16, #tpu.memory_space<vmem>>, %arg7: memref<1x128xf32, #tpu.memory_space<vmem>>, %arg8: memref<2x128xf32, #tpu.memory_space<vmem>>) attributes {dimension_semantics = [#tpu.dimension_semantics<parallel>], iteration_bounds = array<i64: 1>, scalar_prefetch = 0 : i64, scratch_operands = 0 : i64, tpu.core_type = #tpu.core_type<tc>, window_params = [{transform_indices = @transform_0, window_bounds = array<i64: 2, 800>}, {pipeline_mode = #tpu.pipeline_mode<synchronous>, transform_indices = @transform_1, window_bounds = array<i64: 800, 512>}, {pipeline_mode = #tpu.pipeline_mode<synchronous>, transform_indices = @transform_2, window_bounds = array<i64: 1, 512>}, {pipeline_mode = #tpu.pipeline_mode<synchronous>, transform_indices = @transform_3, window_bounds = array<i64: 512, 256>}, {pipeline_mode = #tpu.pipeline_mode<synchronous>, transform_indices = @transform_4, window_bounds = array<i64: 1, 256>}, {pipeline_mode = #tpu.pipeline_mode<synchronous>, transform_indices = @transform_5, window_bounds = array<i64: 256, 128>}, {pipeline_mode = #tpu.pipeline_mode<synchronous>, transform_indices = @transform_6, window_bounds = array<i64: 1, 128>}, {transform_indices = @transform_7, window_bounds = array<i64: 2, 128>}]} {
    %c0 = arith.constant 0 : index
    %c0_0 = arith.constant 0 : index
    %0 = vector.load %arg1[%c0, %c0_0] : memref<2x800xf32, #tpu.memory_space<vmem>>, vector<2x800xf32>
    %1 = arith.truncf %0 : vector<2x800xf32> to vector<2x800xbf16>
    %c0_1 = arith.constant 0 : index
    %c0_2 = arith.constant 0 : index
    %2 = vector.load %arg2[%c0_1, %c0_2] : memref<800x512xbf16, #tpu.memory_space<vmem>>, vector<800x512xbf16>
    %cst = arith.constant dense<0.000000e+00> : vector<2x512xf32>
    %3 = tpu.matmul %1, %2, %cst {dimension_numbers = #tpu.dot_dimension_numbers<[1], [0], [0], [1], [0, 0, 1, 1], [], []>} : vector<2x800xbf16>, vector<800x512xbf16>, vector<2x512xf32> -> vector<2x512xf32>
    %c0_3 = arith.constant 0 : index
    %c0_4 = arith.constant 0 : index
    %4 = vector.load %arg3[%c0_3, %c0_4] : memref<1x512xf32, #tpu.memory_space<vmem>>, vector<1x512xf32>
    %5 = vector.broadcast %4 : vector<1x512xf32> to vector<2x512xf32>
    %6 = arith.addf %3, %5 : vector<2x512xf32>
    %cst_5 = arith.constant 0.000000e+00 : f32
    %7 = vector.broadcast %cst_5 : f32 to vector<2x512xf32>
    %8 = arith.maximumf %6, %7 : vector<2x512xf32>
    %9 = arith.truncf %8 : vector<2x512xf32> to vector<2x512xbf16>
    %c0_6 = arith.constant 0 : index
    %c0_7 = arith.constant 0 : index
    %10 = vector.load %arg4[%c0_6, %c0_7] : memref<512x256xbf16, #tpu.memory_space<vmem>>, vector<512x256xbf16>
    %cst_8 = arith.constant dense<0.000000e+00> : vector<2x256xf32>
    %11 = tpu.matmul %9, %10, %cst_8 {dimension_numbers = #tpu.dot_dimension_numbers<[1], [0], [0], [1], [0, 0, 1, 1], [], []>} : vector<2x512xbf16>, vector<512x256xbf16>, vector<2x256xf32> -> vector<2x256xf32>
    %c0_9 = arith.constant 0 : index
    %c0_10 = arith.constant 0 : index
    %12 = vector.load %arg5[%c0_9, %c0_10] : memref<1x256xf32, #tpu.memory_space<vmem>>, vector<1x256xf32>
    %13 = vector.broadcast %12 : vector<1x256xf32> to vector<2x256xf32>
    %14 = arith.addf %11, %13 : vector<2x256xf32>
    %cst_11 = arith.constant 0.000000e+00 : f32
    %15 = vector.broadcast %cst_11 : f32 to vector<2x256xf32>
    %16 = arith.maximumf %14, %15 : vector<2x256xf32>
    %17 = arith.truncf %16 : vector<2x256xf32> to vector<2x256xbf16>
    %c0_12 = arith.constant 0 : index
    %c0_13 = arith.constant 0 : index
    %18 = vector.load %arg6[%c0_12, %c0_13] : memref<256x128xbf16, #tpu.memory_space<vmem>>, vector<256x128xbf16>
    %cst_14 = arith.constant dense<0.000000e+00> : vector<2x128xf32>
    %19 = tpu.matmul %17, %18, %cst_14 {dimension_numbers = #tpu.dot_dimension_numbers<[1], [0], [0], [1], [0, 0, 1, 1], [], []>} : vector<2x256xbf16>, vector<256x128xbf16>, vector<2x128xf32> -> vector<2x128xf32>
    %c0_15 = arith.constant 0 : index
    %c0_16 = arith.constant 0 : index
    %20 = vector.load %arg7[%c0_15, %c0_16] : memref<1x128xf32, #tpu.memory_space<vmem>>, vector<1x128xf32>
    %21 = vector.broadcast %20 : vector<1x128xf32> to vector<2x128xf32>
    %22 = arith.addf %19, %21 : vector<2x128xf32>
    %c0_17 = arith.constant 0 : index
    %c0_18 = arith.constant 0 : index
    %23 = vector.load %arg8[%c0_17, %c0_18] : memref<2x128xf32, #tpu.memory_space<vmem>>, vector<2x128xf32>
    tpu.vector_store %arg8[%c0_17, %c0_18], %22 {strides = array<i32>} : memref<2x128xf32, #tpu.memory_space<vmem>>, vector<2x128xf32>,
    return
  }
  func.func @transform_0(%arg0: i32) -> (i32, i32) {
    %c0_i32 = arith.constant 0 : i32
    %c0_i32_0 = arith.constant 0 : i32
    return %arg0, %c0_i32 : i32, i32
  }
  func.func @transform_1(%arg0: i32) -> (i32, i32) {
    %c0_i32 = arith.constant 0 : i32
    %c0_i32_0 = arith.constant 0 : i32
    %c0_i32_1 = arith.constant 0 : i32
    return %c0_i32, %c0_i32_0 : i32, i32
  }
  func.func @transform_2(%arg0: i32) -> (i32, i32) {
    %c0_i32 = arith.constant 0 : i32
    %c0_i32_0 = arith.constant 0 : i32
    %c0_i32_1 = arith.constant 0 : i32
    return %c0_i32, %c0_i32_0 : i32, i32
  }
  func.func @transform_3(%arg0: i32) -> (i32, i32) {
    %c0_i32 = arith.constant 0 : i32
    %c0_i32_0 = arith.constant 0 : i32
    %c0_i32_1 = arith.constant 0 : i32
    return %c0_i32, %c0_i32_0 : i32, i32
  }
  func.func @transform_4(%arg0: i32) -> (i32, i32) {
    %c0_i32 = arith.constant 0 : i32
    %c0_i32_0 = arith.constant 0 : i32
    %c0_i32_1 = arith.constant 0 : i32
    return %c0_i32, %c0_i32_0 : i32, i32
  }
  func.func @transform_5(%arg0: i32) -> (i32, i32) {
    %c0_i32 = arith.constant 0 : i32
    %c0_i32_0 = arith.constant 0 : i32
    %c0_i32_1 = arith.constant 0 : i32
    return %c0_i32, %c0_i32_0 : i32, i32
  }
  func.func @transform_6(%arg0: i32) -> (i32, i32) {
    %c0_i32 = arith.constant 0 : i32
    %c0_i32_0 = arith.constant 0 : i32
    %c0_i32_1 = arith.constant 0 : i32
    return %c0_i32, %c0_i32_0 : i32, i32
  }
  func.func @transform_7(%arg0: i32) -> (i32, i32) {
    %c0_i32 = arith.constant 0 : i32
    %c0_i32_0 = arith.constant 0 : i32
    return %arg0, %c0_i32 : i32, i32
  }
}

</mosaic_0001>

<bundles_post_ra>
// kernel: dbn_forward_pallas.1
= control target key start
LH: loop header
LB: loop body
LE: loop exit
PB: predicated region body
PF: predicated region fallthrough
CT: control target
= control target key end

     0   :  { %12 = vsyncpa [#allocation3], 0  ;;  %s3387_s0 = inlined_call_operand.vmem [shape: f32[2,800], index: 0, kind: input, shape index: {}]   ;;  %s3388_s1 = inlined_call_operand.hbm [shape: bf16[800,512], index: 1, kind: input, shape index: {}]   ;;  %s3389_s2 = inlined_call_operand.vmem [shape: f32[1,512], index: 2, kind: input, shape index: {}]   ;;  %s3390_s3 = inlined_call_operand.hbm [shape: bf16[512,256], index: 3, kind: input, shape index: {}]   ;;  %s3391_s4 = inlined_call_operand.vmem [shape: f32[1,256], index: 4, kind: input, shape index: {}]   ;;  %s3392_s5 = inlined_call_operand.vmem [shape: bf16[256,128], index: 5, kind: input, shape index: {}]   ;;  %s3393_s6 = inlined_call_operand.vmem [shape: f32[1,128], index: 6, kind: input, shape index: {}]   ;;  %s3394_s7 = inlined_call_operand.hbm [shape: f32[2,128], index: 7, kind: output, shape index: {}]  }
   0x1   :  { %13 = vsyncpa [#allocation6], 0 }
   0x2   :  { %14 = vsyncpa [#allocation4], 0  ;;  %s3173_s24 = smov [#allocation2]   ;;  %s3101_s28 = scalar_lea.hbm %s3388_s1, 25600 }
   0x3   :  { %s22_s25 = sshll.u32 %s3173_s24, 4  ;;  %p3102_p0 = scmp.ne.s32.totalorder %s3388_s1, %s3101_s28  ;;  %s23_s25 = int_to_ptr.vmem [resolvable:$true] %s22_s25 }
   0x4   :  { %p3105_p1 = scmp.lt.u32.totalorder %s3101_s28, %s3388_s1 }
   0x6   :  { %p3107_p2 = pnand %p3105_p1, %p3102_p0 }
   0x8   :  { %3110 = shalt.err (!%p3107_p2)
}
   0x9   :  { %s3111_s10 = scalar_lea.vmem %s23_s25, 25600  ;;  %p3116_p4 = scmp.lt.s32.totalorder %s23_s25, %s23_s25 }
   0xa   :  { %p3112_p3 = scmp.ne.s32.totalorder %s23_s25, %s3111_s10  ;;  %p3117_p5 = scmp.lt.s32.totalorder %s3111_s10, %s3111_s10 }
   0xc   :  { %p3118_p6 = por %p3117_p5, %p3116_p4 }
   0xe   :  { %p3119_p7 = pnand %p3118_p6, %p3112_p3 }
  0x10   :  { %3122 = shalt.err (!%p3119_p7)
}
  0x11   :  { %s3174_s11 = smov 256   ;;  %s3175_s12 = smov 16  }
  0x12   :  { %28 = dma.hbm_to_vmem [thread:$0]  %s3388_s1, 25600, %s23_s25, [#allocation3], %s3174_s11, %s3174_s11, %s3175_s12  }
  0x13   :  { %s3176_s15 = smov [#allocation5]   ;;  %s3123_s19 = scalar_lea.hbm %s3390_s3, 8192 }
  0x14   :  { %s36_s16 = sshll.u32 %s3176_s15, 4  ;;  %p3124_p8 = scmp.ne.s32.totalorder %s3390_s3, %s3123_s19  ;;  %s37_s16 = int_to_ptr.vmem [resolvable:$true] %s36_s16 }
  0x15   :  { %p3127_p9 = scmp.lt.u32.totalorder %s3123_s19, %s3390_s3 }
  0x17   :  { %p3129_p10 = pnand %p3127_p9, %p3124_p8 }
  0x19   :  { %3132 = shalt.err (!%p3129_p10)
}
  0x1a   :  { %s3133_s24 = scalar_lea.vmem %s37_s16, 8192  ;;  %p3138_p12 = scmp.lt.s32.totalorder %s37_s16, %s37_s16 }
  0x1b   :  { %p3134_p11 = scmp.ne.s32.totalorder %s37_s16, %s3133_s24  ;;  %p3139_p13 = scmp.lt.s32.totalorder %s3133_s24, %s3133_s24 }
  0x1d   :  { %p3140_p0 = por %p3139_p13, %p3138_p12 }
  0x1f   :  { %p3141_p1 = pnand %p3140_p0, %p3134_p11 }
  0x21   :  { %3144 = shalt.err (!%p3141_p1)
}
  0x22   :  { %s3177_s1 = smov 128   ;;  %s3178_s25 = smov 8  }
  0x23   :  { %42 = dma.hbm_to_vmem [thread:$0]  %s3390_s3, 8192, %s37_s16, [#allocation6], %s3177_s1, %s3177_s1, %s3178_s25  }
  0x24   :  { %3167 = dma.done.wait [#allocation3], 25600  }
  0x25   :  { %3168 = vsyncadd [#allocation3], 4294941696 }
  0x26   :  { %3169 = dma.done.wait [#allocation6], 8192  }
  0x27   :  { %3170 = vsyncadd [#allocation6], 4294959104  ;;  %v2687_v0 = vld [vmem:[#allocation2 + $0x4] ss:$16 sps:$4 sm:$0xff]   ;;  %v2691_v2 = vld [vmem:[#allocation2] ss:$16 sps:$4 sm:$0xff]   ;;  %v64_v38 = vlaneseq }
  0x28   :  { %v2689_v1 = vld [vmem:[#allocation2 + $0x204] ss:$16 sps:$4 sm:$0xff]   ;;  %1333 = vmatprep.subr.bf16.mxu1 %v2687_v0  ;;  %v2692_v3 = vld [vmem:[#allocation2 + $0x200] ss:$16 sps:$4 sm:$0xff]   ;;  %v3179_v36 = vmov 1983009808  }
  0x29   :  { %1374 = vmatprep.subr.bf16.mxu0 %v2689_v1  ;;  %v2693_v4 = vld [vmem:[#allocation2 + $0x24] ss:$16 sps:$4 sm:$0xff]   ;;  %1334 = vmatpush1.bf16.msra.mxu1 %v2691_v2  ;;  %v2697_v6 = vld [vmem:[#allocation2 + $0x20] ss:$16 sps:$4 sm:$0xff]   ;;  %v62_v37 = vunpack.c.l.s4 %v3179_v36  ;;  %v3246_v43 = vshrl.u32 %v64_v38, 7  ;;  %vm1329_vm0 = vcmask 261120  }
  0x2a   :  { %1375 = vmatpush1.bf16.msra.mxu0 %v2692_v3  ;;  %v2695_v5 = vld [vmem:[#allocation2 + $0x224] ss:$16 sps:$4 sm:$0xff]   ;;  %1335 = vmatprep.subr.bf16.mxu1 %v2693_v4  ;;  %v2698_v7 = vld [vmem:[#allocation2 + $0x220] ss:$16 sps:$4 sm:$0xff]   ;;  %s3181_s15 = smov [#allocation7]  }
  0x2b   :  { %1376 = vmatprep.subr.bf16.mxu0 %v2695_v5  ;;  %v2699_v8 = vld [vmem:[#allocation2 + $0x44] ss:$16 sps:$4 sm:$0xff]   ;;  %v2703_v10 = vld [vmem:[#allocation2 + $0x40] ss:$16 sps:$4 sm:$0xff]   ;;  %v63_v42 = vunpack.c.0.s8 %v62_v37  ;;  %v2819_v37 = vld [vmem:[#allocation2 + $0xac] ss:$16 sps:$4 sm:$0xff]  }
  0x2c   :  { %v2701_v9 = vld [vmem:[#allocation2 + $0x244] ss:$16 sps:$4 sm:$0xff]   ;;  %v2704_v11 = vld [vmem:[#allocation2 + $0x240] ss:$16 sps:$4 sm:$0xff]   ;;  %s2333_s16 = sshll.u32 %s3181_s15, 4  ;;  %s2334_s16 = int_to_ptr.vmem [resolvable:$true] %s2333_s16 }
  0x2d   :  { %1336 = vmatpush1.bf16.msra.mxu1 %v2697_v6  ;;  %v2705_v12 = vld [vmem:[#allocation2 + $0x64] ss:$16 sps:$4 sm:$0xff]   ;;  %v2709_v14 = vld [vmem:[#allocation2 + $0x60] ss:$16 sps:$4 sm:$0xff]   ;;  %v3249_v49 = vsub.s32 %v63_v42, %v3246_v43  ;;  %v3268_v42 = vld [vmem:[%s3387_s0 + $0x8] sm:$0x3f]  ;;  %p3150_p3 = scmp.lt.s32.totalorder %s2334_s16, %s2334_s16 }
  0x2e   :  { %1377 = vmatpush1.bf16.msra.mxu0 %v2698_v7  ;;  %1337 = vmatprep.subr.bf16.mxu1 %v2699_v8  ;;  %v2707_v13 = vld [vmem:[#allocation2 + $0x264] ss:$16 sps:$4 sm:$0xff]   ;;  %v2710_v15 = vld [vmem:[#allocation2 + $0x260] ss:$16 sps:$4 sm:$0xff]   ;;  %s3145_s17 = scalar_lea.vmem %s2334_s16, 32 }
  0x2f   :  { %1378 = vmatprep.subr.bf16.mxu0 %v2701_v9  ;;  %v2711_v16 = vld [vmem:[#allocation2 + $0x84] ss:$16 sps:$4 sm:$0xff]   ;;  %v2715_v18 = vld [vmem:[#allocation2 + $0x80] ss:$16 sps:$4 sm:$0xff]   ;;  %p3146_p2 = scmp.ne.s32.totalorder %s2334_s16, %s3145_s17  ;;  %p3151_p4 = scmp.lt.s32.totalorder %s3145_s17, %s3145_s17 }
  0x30   :  { %v2713_v17 = vld [vmem:[#allocation2 + $0x284] ss:$16 sps:$4 sm:$0xff]   ;;  %v2716_v19 = vld [vmem:[#allocation2 + $0x280] ss:$16 sps:$4 sm:$0xff]  }
  0x31   :  { %1338 = vmatpush1.bf16.msra.mxu1 %v2703_v10  ;;  %v2717_v20 = vld [vmem:[#allocation2 + $0xa4] ss:$16 sps:$4 sm:$0xff]   ;;  %v2721_v22 = vld [vmem:[#allocation2 + $0xa0] ss:$16 sps:$4 sm:$0xff]   ;;  %p3152_p5 = por %p3151_p4, %p3150_p3 }
  0x32   :  { %1379 = vmatpush1.bf16.msra.mxu0 %v2704_v11  ;;  %1339 = vmatprep.subr.bf16.mxu1 %v2705_v12  ;;  %v2719_v21 = vld [vmem:[#allocation2 + $0x2a4] ss:$16 sps:$4 sm:$0xff]   ;;  %v2722_v23 = vld [vmem:[#allocation2 + $0x2a0] ss:$16 sps:$4 sm:$0xff]  }
  0x33   :  { %1380 = vmatprep.subr.bf16.mxu0 %v2707_v13  ;;  %v2723_v24 = vld [vmem:[#allocation2 + $0xc4] ss:$16 sps:$4 sm:$0xff]   ;;  %v2727_v26 = vld [vmem:[#allocation2 + $0xc0] ss:$16 sps:$4 sm:$0xff]   ;;  %p3153_p6 = pnand %p3152_p5, %p3146_p2 }
  0x34   :  { %v2725_v25 = vld [vmem:[#allocation2 + $0x2c4] ss:$16 sps:$4 sm:$0xff]   ;;  %v2728_v27 = vld [vmem:[#allocation2 + $0x2c0] ss:$16 sps:$4 sm:$0xff]  }
  0x35   :  { %1340 = vmatpush1.bf16.msra.mxu1 %v2709_v14  ;;  %v2729_v28 = vld [vmem:[#allocation2 + $0xe4] ss:$16 sps:$4 sm:$0xff]   ;;  %v2733_v30 = vld [vmem:[#allocation2 + $0xe0] ss:$16 sps:$4 sm:$0xff]  }
  0x36   :  { %1381 = vmatpush1.bf16.msra.mxu0 %v2710_v15  ;;  %1341 = vmatprep.subr.bf16.mxu1 %v2711_v16  ;;  %v2731_v29 = vld [vmem:[#allocation2 + $0x2e4] ss:$16 sps:$4 sm:$0xff]   ;;  %v2734_v31 = vld [vmem:[#allocation2 + $0x2e0] ss:$16 sps:$4 sm:$0xff]   ;;  %v2789_v15 = vld [vmem:[#allocation2 + $0xc] ss:$16 sps:$4 sm:$0xff]  }
  0x37   :  { %1382 = vmatprep.subr.bf16.mxu0 %v2713_v17  ;;  %v2735_v32 = vld [vmem:[#allocation2 + $0x104] ss:$16 sps:$4 sm:$0xff]   ;;  %v2739_v34 = vld [vmem:[#allocation2 + $0x100] ss:$16 sps:$4 sm:$0xff]  }
  0x38   :  { %v2737_v33 = vld [vmem:[#allocation2 + $0x304] ss:$16 sps:$4 sm:$0xff]   ;;  %v2740_v35 = vld [vmem:[#allocation2 + $0x300] ss:$16 sps:$4 sm:$0xff]  }
  0x39   :  { %1342 = vmatpush1.bf16.msra.mxu1 %v2715_v18  ;;  %v2741_v39 = vld [vmem:[#allocation2 + $0x124] ss:$16 sps:$4 sm:$0xff]   ;;  %v2745_v41 = vld [vmem:[#allocation2 + $0x120] ss:$16 sps:$4 sm:$0xff]  }
  0x3a   :  { %1383 = vmatpush1.bf16.msra.mxu0 %v2716_v19  ;;  %1343 = vmatprep.subr.bf16.mxu1 %v2717_v20  ;;  %v2743_v40 = vld [vmem:[#allocation2 + $0x324] ss:$16 sps:$4 sm:$0xff]   ;;  %v2746_v44 = vld [vmem:[#allocation2 + $0x320] ss:$16 sps:$4 sm:$0xff]   ;;  %v2787_v19 = vld [vmem:[#allocation2 + $0x8] ss:$16 sps:$4 sm:$0xff]  }
  0x3b   :  { %1384 = vmatprep.subr.bf16.mxu0 %v2719_v21  ;;  %v2747_v45 = vld [vmem:[#allocation2 + $0x144] ss:$16 sps:$4 sm:$0xff]   ;;  %v2751_v47 = vld [vmem:[#allocation2 + $0x140] ss:$16 sps:$4 sm:$0xff]   ;;  %v2795_v21 = vld [vmem:[#allocation2 + $0x2c] ss:$16 sps:$4 sm:$0xff]  }
  0x3c   :  { %v2749_v46 = vld [vmem:[#allocation2 + $0x344] ss:$16 sps:$4 sm:$0xff]   ;;  %v2752_v48 = vld [vmem:[#allocation2 + $0x340] ss:$16 sps:$4 sm:$0xff]  }
  0x3d   :  { %1344 = vmatpush1.bf16.msra.mxu1 %v2721_v22  ;;  %v2753_v50 = vld [vmem:[#allocation2 + $0x164] ss:$16 sps:$4 sm:$0xff]   ;;  %v2757_v53 = vld [vmem:[#allocation2 + $0x160] ss:$16 sps:$4 sm:$0xff]  }
  0x3e   :  { %1385 = vmatpush1.bf16.msra.mxu0 %v2722_v23  ;;  %1345 = vmatprep.subr.bf16.mxu1 %v2723_v24  ;;  %v2755_v51 = vld [vmem:[#allocation2 + $0x364] ss:$16 sps:$4 sm:$0xff]   ;;  %v2758_v56 = vld [vmem:[#allocation2 + $0x360] ss:$16 sps:$4 sm:$0xff]   ;;  %v2793_v23 = vld [vmem:[#allocation2 + $0x28] ss:$16 sps:$4 sm:$0xff]  }
  0x3f   :  { %1386 = vmatprep.subr.bf16.mxu0 %v2725_v25  ;;  %v56_v52 = vld [vmem:[%s3387_s0] sm:$0xff]  ;;  %v2801_v25 = vld [vmem:[#allocation2 + $0x4c] ss:$16 sps:$4 sm:$0xff]  }
  0x40   :  { %v67_v54 = vrot.slane %v56_v52, %v3249_v49  ;;  %v60_v55 = vcombine.high %v56_v52, %v56_v52  ;;  %v2759_v57 = vld [vmem:[#allocation2 + $0x184] ss:$16 sps:$4 sm:$0xff]   ;;  %v2763_v61 = vld [vmem:[#allocation2 + $0x180] ss:$16 sps:$4 sm:$0xff]  }
  0x41   :  { %1346 = vmatpush1.bf16.msra.mxu1 %v2727_v26  ;;  %v2761_v58 = vld [vmem:[#allocation2 + $0x384] ss:$16 sps:$4 sm:$0xff]   ;;  %v2764_v0 = vld [vmem:[#allocation2 + $0x380] ss:$16 sps:$4 sm:$0xff]  }
  0x42   :  { %1387 = vmatpush1.bf16.msra.mxu0 %v2728_v27  ;;  %1347 = vmatprep.subr.bf16.mxu1 %v2729_v28  ;;  %v75_v59 = vcombine.high %v67_v54, %v67_v54  ;;  %v74_v60 = vrot.slane %v60_v55, %v3249_v49  ;;  %v2765_v1 = vld [vmem:[#allocation2 + $0x1a4] ss:$16 sps:$4 sm:$0xff]   ;;  %v2769_v4 = vld [vmem:[#allocation2 + $0x1a0] ss:$16 sps:$4 sm:$0xff]   ;;  %v3259_v16 = vpack.c.bf16 %v67_v54, %v67_v54  ;;  %v2799_v27 = vld [vmem:[#allocation2 + $0x48] ss:$16 sps:$4 sm:$0xff]  }
  0x43   :  { %1388 = vmatprep.subr.bf16.mxu0 %v2731_v29  ;;  %v2767_v2 = vld [vmem:[#allocation2 + $0x3a4] ss:$16 sps:$4 sm:$0xff]   ;;  %v2770_v5 = vld [vmem:[#allocation2 + $0x3a0] ss:$16 sps:$4 sm:$0xff]   ;;  %v2807_v29 = vld [vmem:[#allocation2 + $0x6c] ss:$16 sps:$4 sm:$0xff]  }
  0x44   :  { %v101_v62 = vpack.c.bf16 %v75_v59, %v75_v59  ;;  %v76_v63 = vcombine.high %v74_v60, %v74_v60  ;;  %v2771_v6 = vld [vmem:[#allocation2 + $0x1c4] ss:$16 sps:$4 sm:$0xff]   ;;  %v2775_v8 = vld [vmem:[#allocation2 + $0x1c0] ss:$16 sps:$4 sm:$0xff]   ;;  %v3261_v18 = vpack.c.bf16 %v74_v60, %v74_v60  ;;  %v2837_v55 = vld [vmem:[#allocation2 + $0x10c] ss:$16 sps:$4 sm:$0xff]  }
  0x45   :  { %1348 = vmatpush1.bf16.msra.mxu1 %v2733_v30  ;;  %v2773_v7 = vld [vmem:[#allocation2 + $0x3c4] ss:$16 sps:$4 sm:$0xff]   ;;  %v2776_v9 = vld [vmem:[#allocation2 + $0x3c0] ss:$16 sps:$4 sm:$0xff]   ;;  %v2843_v59 = vld [vmem:[#allocation2 + $0x12c] ss:$16 sps:$4 sm:$0xff]  }
  0x46   :  { %1389 = vmatpush1.bf16.msra.mxu0 %v2734_v31  ;;  %1349 = vmatprep.subr.bf16.mxu1 %v2735_v32  ;;  %v3256_v3 = vpack.c.bf16 %v76_v63, %v76_v63  ;;  %v2777_v10 = vld [vmem:[#allocation2 + $0x1e4] ss:$16 sps:$4 sm:$0xff]   ;;  %v2781_v12 = vld [vmem:[#allocation2 + $0x1e0] ss:$16 sps:$4 sm:$0xff]   ;;  %v2805_v31 = vld [vmem:[#allocation2 + $0x68] ss:$16 sps:$4 sm:$0xff]  }
  0x47   :  { %1390 = vmatprep.subr.bf16.mxu0 %v2737_v33  ;;  %1365 = vmatprep.mubr.bf16.mxu1 %v101_v62  ;;  %v2779_v11 = vld [vmem:[#allocation2 + $0x3e4] ss:$16 sps:$4 sm:$0xff]   ;;  %v2782_v13 = vld [vmem:[#allocation2 + $0x3e0] ss:$16 sps:$4 sm:$0xff]   ;;  %v2813_v33 = vld [vmem:[#allocation2 + $0x8c] ss:$16 sps:$4 sm:$0xff]  }
  0x48   :  { %1406 = vmatprep.mubr.bf16.mxu0 %v3256_v3  ;;  %v2786_v14 = vld [vmem:[#allocation2 + $0x404] ss:$16 sps:$4 sm:$0xff]   ;;  %v2784_v17 = vld [vmem:[#allocation2 + $0x400] ss:$16 sps:$4 sm:$0xff]   ;;  %v2849_v63 = vld [vmem:[#allocation2 + $0x14c] ss:$16 sps:$4 sm:$0xff]  }
  0x49   :  { %1350 = vmatpush1.bf16.msra.mxu1 %v2739_v34  ;;  %v2792_v20 = vld [vmem:[#allocation2 + $0x424] ss:$16 sps:$4 sm:$0xff]   ;;  %v2790_v22 = vld [vmem:[#allocation2 + $0x420] ss:$16 sps:$4 sm:$0xff]  }
  0x4a   :  { %1391 = vmatpush1.bf16.msra.mxu0 %v2740_v35  ;;  %1351 = vmatprep.subr.bf16.mxu1 %v2741_v39  ;;  %v2798_v24 = vld [vmem:[#allocation2 + $0x444] ss:$16 sps:$4 sm:$0xff]   ;;  %v2796_v26 = vld [vmem:[#allocation2 + $0x440] ss:$16 sps:$4 sm:$0xff]   ;;  %v2811_v35 = vld [vmem:[#allocation2 + $0x88] ss:$16 sps:$4 sm:$0xff]  }
  0x4b   :  { %1392 = vmatprep.subr.bf16.mxu0 %v2743_v40  ;;  %v2804_v28 = vld [vmem:[#allocation2 + $0x464] ss:$16 sps:$4 sm:$0xff]   ;;  %v2802_v30 = vld [vmem:[#allocation2 + $0x460] ss:$16 sps:$4 sm:$0xff]   ;;  %v2817_v39 = vld [vmem:[#allocation2 + $0xa8] ss:$16 sps:$4 sm:$0xff]  }
  0x4c   :  { %v2810_v32 = vld [vmem:[#allocation2 + $0x484] ss:$16 sps:$4 sm:$0xff]   ;;  %v2808_v34 = vld [vmem:[#allocation2 + $0x480] ss:$16 sps:$4 sm:$0xff]  }
  0x4d   :  { %1352 = vmatpush1.bf16.msra.mxu1 %v2745_v41  ;;  %v2816_v36 = vld [vmem:[#allocation2 + $0x4a4] ss:$16 sps:$4 sm:$0xff]   ;;  %v2814_v38 = vld [vmem:[#allocation2 + $0x4a0] ss:$16 sps:$4 sm:$0xff]   ;;  %v2825_v41 = vld [vmem:[#allocation2 + $0xcc] ss:$16 sps:$4 sm:$0xff]  }
  0x4e   :  { %1393 = vmatpush1.bf16.msra.mxu0 %v2746_v44  ;;  %1353 = vmatprep.subr.bf16.mxu1 %v2747_v45  ;;  %v2822_v40 = vld [vmem:[#allocation2 + $0x4c4] ss:$16 sps:$4 sm:$0xff]   ;;  %v3272_v44 = vrot.slane %v3268_v42, %v3249_v49  ;;  %v2820_v45 = vld [vmem:[#allocation2 + $0x4c0] ss:$16 sps:$4 sm:$0xff]  }
  0x4f   :  { %1394 = vmatprep.subr.bf16.mxu0 %v2749_v46  ;;  %v2823_v46 = vld [vmem:[#allocation2 + $0xc8] ss:$16 sps:$4 sm:$0xff]   ;;  %v2826_v52 = vld [vmem:[#allocation2 + $0x4e0] ss:$16 sps:$4 sm:$0xff]   ;;  %v2834_v54 = vld [vmem:[#allocation2 + $0x504] ss:$16 sps:$4 sm:$0xff]  }
  0x50   :  { %v2838_v60 = vld [vmem:[#allocation2 + $0x520] ss:$16 sps:$4 sm:$0xff]  }
  0x51   :  { %1354 = vmatpush1.bf16.msra.mxu1 %v2751_v47  ;;  %v92_v47 = vcombine.high %v3272_v44, %v3272_v44 }
  0x52   :  { %1395 = vmatpush1.bf16.msra.mxu0 %v2752_v48  ;;  %1355 = vmatprep.subr.bf16.mxu1 %v2753_v50  ;;  %v2828_v48 = vld [vmem:[#allocation2 + $0x4e4] ss:$16 sps:$4 sm:$0xff]   ;;  %v2831_v50 = vld [vmem:[#allocation2 + $0xec] ss:$16 sps:$4 sm:$0xff]  }
  0x53   :  { %1396 = vmatprep.subr.bf16.mxu0 %v2755_v51  ;;  %v3276_v51 = vpack.c.bf16 %v92_v47, %v92_v47  ;;  %v2983_v47 = vld [vmem:[#allocation2 + $0x628] ss:$16 sps:$4 sm:$0xff]  }
  0x55   :  { %1356 = vmatpush1.bf16.msra.mxu1 %v2757_v53  ;;  %v2829_v53 = vld [vmem:[#allocation2 + $0xe8] ss:$16 sps:$4 sm:$0xff]  }
  0x56   :  { %1397 = vmatpush1.bf16.msra.mxu0 %v2758_v56  ;;  %1357 = vmatprep.subr.bf16.mxu1 %v2759_v57  ;;  %v2832_v56 = vld [vmem:[#allocation2 + $0x500] ss:$16 sps:$4 sm:$0xff]   ;;  %v2835_v57 = vld [vmem:[#allocation2 + $0x108] ss:$16 sps:$4 sm:$0xff]  }
  0x57   :  { %1398 = vmatprep.subr.bf16.mxu0 %v2761_v58  ;;  %v2840_v58 = vld [vmem:[#allocation2 + $0x524] ss:$16 sps:$4 sm:$0xff]  }
  0x59   :  { %1358 = vmatpush1.bf16.msra.mxu1 %v2763_v61  ;;  %v2841_v61 = vld [vmem:[#allocation2 + $0x128] ss:$16 sps:$4 sm:$0xff]  }
  0x5a   :  { %1399 = vmatpush1.bf16.msra.mxu0 %v2764_v0  ;;  %1359 = vmatprep.subr.bf16.mxu1 %v2765_v1  ;;  %v2844_v0 = vld [vmem:[#allocation2 + $0x540] ss:$16 sps:$4 sm:$0xff]   ;;  %v2847_v1 = vld [vmem:[#allocation2 + $0x148] ss:$16 sps:$4 sm:$0xff]  }
  0x5b   :  { %1400 = vmatprep.subr.bf16.mxu0 %v2767_v2  ;;  %v2852_v2 = vld [vmem:[#allocation2 + $0x564] ss:$16 sps:$4 sm:$0xff]  }
  0x5d   :  { %1360 = vmatpush1.bf16.msra.mxu1 %v2769_v4  ;;  %v2855_v4 = vld [vmem:[#allocation2 + $0x16c] ss:$16 sps:$4 sm:$0xff]  }
  0x5e   :  { %1401 = vmatpush1.bf16.msra.mxu0 %v2770_v5  ;;  %1361 = vmatprep.subr.bf16.mxu1 %v2771_v6  ;;  %v2850_v5 = vld [vmem:[#allocation2 + $0x560] ss:$16 sps:$4 sm:$0xff]   ;;  %v2853_v6 = vld [vmem:[#allocation2 + $0x168] ss:$16 sps:$4 sm:$0xff]  }
  0x5f   :  { %1402 = vmatprep.subr.bf16.mxu0 %v2773_v7  ;;  %v2858_v7 = vld [vmem:[#allocation2 + $0x584] ss:$16 sps:$4 sm:$0xff]  }
  0x61   :  { %1362 = vmatpush1.bf16.msra.mxu1 %v2775_v8  ;;  %v2861_v8 = vld [vmem:[#allocation2 + $0x18c] ss:$16 sps:$4 sm:$0xff]  }
  0x62   :  { %1403 = vmatpush1.bf16.msra.mxu0 %v2776_v9  ;;  %1363 = vmatprep.subr.bf16.mxu1 %v2777_v10  ;;  %v2856_v9 = vld [vmem:[#allocation2 + $0x580] ss:$16 sps:$4 sm:$0xff]   ;;  %v2859_v10 = vld [vmem:[#allocation2 + $0x188] ss:$16 sps:$4 sm:$0xff]  }
  0x63   :  { %1404 = vmatprep.subr.bf16.mxu0 %v2779_v11  ;;  %v2864_v11 = vld [vmem:[#allocation2 + $0x5a4] ss:$16 sps:$4 sm:$0xff]  }
  0x65   :  { %1364 = vmatpush1.bf16.msra.mxu1 %v2781_v12  ;;  %v2867_v12 = vld [vmem:[#allocation2 + $0x1ac] ss:$16 sps:$4 sm:$0xff]  }
  0x66   :  { %1405 = vmatpush1.bf16.msra.mxu0 %v2782_v13  ;;  %1497 = vmatprep.subr.bf16.mxu1 %v2789_v15  ;;  %v2862_v13 = vld [vmem:[#allocation2 + $0x5a0] ss:$16 sps:$4 sm:$0xff]   ;;  %v2870_v15 = vld [vmem:[#allocation2 + $0x5c4] ss:$16 sps:$4 sm:$0xff]  }
  0x67   :  { %1415 = vmatprep.subr.bf16.mxu0 %v2786_v14  ;;  %v2865_v14 = vld [vmem:[#allocation2 + $0x1a8] ss:$16 sps:$4 sm:$0xff]  }
  0x68   :  { %1366 = vmatmul.mubr.bf16.vlgmr.msra.gmra.mrb[0].mxu1 %v3259_v16 }
  0x69   :  { %1407 = vmatmul.mubr.bf16.vlgmr.msra.gmra.mrb[0].mxu0 %v3261_v18  ;;  %1498 = vmatpush1.bf16.msra.mxu1 %v2787_v19  ;;  %v2868_v19 = vld [vmem:[#allocation2 + $0x5c0] ss:$16 sps:$4 sm:$0xff]  }
  0x6a   :  { %1416 = vmatpush1.bf16.msra.mxu0 %v2784_v17  ;;  %1499 = vmatprep.subr.bf16.mxu1 %v2795_v21  ;;  %v2873_v17 = vld [vmem:[#allocation2 + $0x1cc] ss:$16 sps:$4 sm:$0xff]   ;;  %v2876_v21 = vld [vmem:[#allocation2 + $0x5e4] ss:$16 sps:$4 sm:$0xff]  }
  0x6b   :  { %1417 = vmatprep.subr.bf16.mxu0 %v2792_v20  ;;  %1529 = vmatprep.mubr.bf16.mxu1 %v101_v62  ;;  %v2846_v62 = vld [vmem:[#allocation2 + $0x544] ss:$16 sps:$4 sm:$0xff]   ;;  %v2871_v20 = vld [vmem:[#allocation2 + $0x1c8] ss:$16 sps:$4 sm:$0xff]  }
  0x6c   :  { %1447 = vmatprep.mubr.bf16.mxu0 %v3276_v51 }
  0x6d   :  { %1500 = vmatpush1.bf16.msra.mxu1 %v2793_v23  ;;  %v2874_v23 = vld [vmem:[#allocation2 + $0x5e0] ss:$16 sps:$4 sm:$0xff]  }
  0x6e   :  { %1418 = vmatpush1.bf16.msra.mxu0 %v2790_v22  ;;  %1501 = vmatprep.subr.bf16.mxu1 %v2801_v25  ;;  %v2879_v22 = vld [vmem:[#allocation2 + $0x1ec] ss:$16 sps:$4 sm:$0xff]  }
  0x6f   :  { %1419 = vmatprep.subr.bf16.mxu0 %v2798_v24  ;;  %v2877_v24 = vld [vmem:[#allocation2 + $0x1e8] ss:$16 sps:$4 sm:$0xff]   ;;  %v2883_v25 = vld [vmem:[#allocation2 + $0x20c] ss:$16 sps:$4 sm:$0xff]  }
  0x71   :  { %1502 = vmatpush1.bf16.msra.mxu1 %v2799_v27  ;;  %v3281_v27 = vpack.c.bf16 %v3272_v44, %v3272_v44  ;;  %v2901_v44 = vld [vmem:[#allocation2 + $0x28c] ss:$16 sps:$4 sm:$0xff]  }
  0x72   :  { %1420 = vmatpush1.bf16.msra.mxu0 %v2796_v26  ;;  %1503 = vmatprep.subr.bf16.mxu1 %v2807_v29  ;;  %v2886_v26 = vld [vmem:[#allocation2 + $0x604] ss:$16 sps:$4 sm:$0xff]   ;;  %v2884_v29 = vld [vmem:[#allocation2 + $0x600] ss:$16 sps:$4 sm:$0xff]  }
  0x73   :  { %1421 = vmatprep.subr.bf16.mxu0 %v2804_v28  ;;  %v2881_v28 = vld [vmem:[#allocation2 + $0x208] ss:$16 sps:$4 sm:$0xff]  }
  0x75   :  { %1504 = vmatpush1.bf16.msra.mxu1 %v2805_v31  ;;  %v2892_v31 = vld [vmem:[#allocation2 + $0x624] ss:$16 sps:$4 sm:$0xff]  }
  0x76   :  { %1422 = vmatpush1.bf16.msra.mxu0 %v2802_v30  ;;  %1505 = vmatprep.subr.bf16.mxu1 %v2813_v33  ;;  %v2889_v30 = vld [vmem:[#allocation2 + $0x22c] ss:$16 sps:$4 sm:$0xff]   ;;  %v2887_v33 = vld [vmem:[#allocation2 + $0x228] ss:$16 sps:$4 sm:$0xff]  }
  0x77   :  { %1423 = vmatprep.subr.bf16.mxu0 %v2810_v32  ;;  %v77_v32 = vcombine.high %v3268_v42, %v3268_v42 }
  0x79   :  { %1506 = vmatpush1.bf16.msra.mxu1 %v2811_v35  ;;  %v2895_v35 = vld [vmem:[#allocation2 + $0x24c] ss:$16 sps:$4 sm:$0xff]  }
  0x7a   :  { %1424 = vmatpush1.bf16.msra.mxu0 %v2808_v34  ;;  %1507 = vmatprep.subr.bf16.mxu1 %v2819_v37  ;;  %v2890_v34 = vld [vmem:[#allocation2 + $0x620] ss:$16 sps:$4 sm:$0xff]   ;;  %v2893_v37 = vld [vmem:[#allocation2 + $0x248] ss:$16 sps:$4 sm:$0xff]  }
  0x7b   :  { %1425 = vmatprep.subr.bf16.mxu0 %v2816_v36  ;;  %v2979_v36 = vld [vmem:[#allocation2 + $0x60c] ss:$16 sps:$4 sm:$0xff]  }
  0x7d   :  { %1508 = vmatpush1.bf16.msra.mxu1 %v2817_v39  ;;  %v91_v39 = vrot.slane %v77_v32, %v3249_v49  ;;  %v2902_v49 = vld [vmem:[#allocation2 + $0x2a8] ss:$16 sps:$4 sm:$0xff]  }
  0x7e   :  { %1426 = vmatpush1.bf16.msra.mxu0 %v2814_v38  ;;  %1509 = vmatprep.subr.bf16.mxu1 %v2825_v41  ;;  %v3180_v38 = vmov 0   ;;  %v2977_v41 = vld [vmem:[#allocation2 + $0x608] ss:$16 sps:$4 sm:$0xff]  }
  0x7f   :  { %1427 = vmatprep.subr.bf16.mxu0 %v2822_v40  ;;  %v2898_v40 = vld [vmem:[#allocation2 + $0x26c] ss:$16 sps:$4 sm:$0xff]   ;;  %v106_v42 = vpack.c.bf16 %v91_v39, %v91_v39  ;;  %v2935_v32 = vld [vmem:[#allocation2 + $0x408] ss:$16 sps:$4 sm:$0xff]  }
  0x80   :  { %v3027_v39 = vld [vmem:[#allocation5 + $0xc4] ss:$8 sps:$4 sm:$0xff]  }
  0x81   :  { %1510 = vmatpush1.bf16.msra.mxu1 %v2823_v46  ;;  %v2899_v46 = vld [vmem:[#allocation2 + $0x288] ss:$16 sps:$4 sm:$0xff]  }
  0x82   :  { %1428 = vmatpush1.bf16.msra.mxu0 %v2820_v45  ;;  %1511 = vmatprep.subr.bf16.mxu1 %v2831_v50  ;;  %v2985_v45 = vld [vmem:[#allocation2 + $0x62c] ss:$16 sps:$4 sm:$0xff]   ;;  %v2905_v50 = vld [vmem:[#allocation2 + $0x2c8] ss:$16 sps:$4 sm:$0xff]  }
  0x83   :  { %1429 = vmatprep.subr.bf16.mxu0 %v2828_v48  ;;  %v2907_v48 = vld [vmem:[#allocation2 + $0x2cc] ss:$16 sps:$4 sm:$0xff]  }
  0x85   :  { %1512 = vmatpush1.bf16.msra.mxu1 %v2829_v53  ;;  %v2989_v53 = vld [vmem:[#allocation5] ss:$8 sps:$4 sm:$0xff]  }
  0x86   :  { %1430 = vmatpush1.bf16.msra.mxu0 %v2826_v52  ;;  %1513 = vmatprep.subr.bf16.mxu1 %v2837_v55  ;;  %v2910_v52 = vld [vmem:[#allocation2 + $0x2ec] ss:$16 sps:$4 sm:$0xff]  }
  0x87   :  { %1431 = vmatprep.subr.bf16.mxu0 %v2834_v54  ;;  %v2991_v54 = vld [vmem:[#allocation5 + $0x4] ss:$8 sps:$4 sm:$0xff]   ;;  %v2994_v55 = vld [vmem:[#allocation5 + $0x14] ss:$8 sps:$4 sm:$0xff]  }
  0x89   :  { %1514 = vmatpush1.bf16.msra.mxu1 %v2835_v57  ;;  %v2992_v57 = vld [vmem:[#allocation5 + $0x10] ss:$8 sps:$4 sm:$0xff]  }
  0x8a   :  { %1432 = vmatpush1.bf16.msra.mxu0 %v2832_v56  ;;  %1515 = vmatprep.subr.bf16.mxu1 %v2843_v59  ;;  %v2908_v56 = vld [vmem:[#allocation2 + $0x2e8] ss:$16 sps:$4 sm:$0xff]   ;;  %v2997_v59 = vld [vmem:[#allocation5 + $0x24] ss:$8 sps:$4 sm:$0xff]  }
  0x8b   :  { %1433 = vmatprep.subr.bf16.mxu0 %v2840_v58  ;;  %v2913_v58 = vld [vmem:[#allocation2 + $0x30c] ss:$16 sps:$4 sm:$0xff]  }
  0x8d   :  { %1516 = vmatpush1.bf16.msra.mxu1 %v2841_v61  ;;  %v2995_v61 = vld [vmem:[#allocation5 + $0x20] ss:$8 sps:$4 sm:$0xff]  }
  0x8e   :  { %1434 = vmatpush1.bf16.msra.mxu0 %v2838_v60  ;;  %1517 = vmatprep.subr.bf16.mxu1 %v2849_v63  ;;  %v2911_v60 = vld [vmem:[#allocation2 + $0x308] ss:$16 sps:$4 sm:$0xff]   ;;  %v3000_v63 = vld [vmem:[#allocation5 + $0x34] ss:$8 sps:$4 sm:$0xff]  }
  0x8f   :  { %1435 = vmatprep.subr.bf16.mxu0 %v2846_v62  ;;  %v2916_v62 = vld [vmem:[#allocation2 + $0x32c] ss:$16 sps:$4 sm:$0xff]  }
  0x91   :  { %1518 = vmatpush1.bf16.msra.mxu1 %v2847_v1  ;;  %v2998_v1 = vld [vmem:[#allocation5 + $0x30] ss:$8 sps:$4 sm:$0xff]  }
  0x92   :  { %1436 = vmatpush1.bf16.msra.mxu0 %v2844_v0  ;;  %1519 = vmatprep.subr.bf16.mxu1 %v2855_v4  ;;  %v2914_v0 = vld [vmem:[#allocation2 + $0x328] ss:$16 sps:$4 sm:$0xff]   ;;  %v3003_v4 = vld [vmem:[#allocation5 + $0x44] ss:$8 sps:$4 sm:$0xff]  }
  0x93   :  { %1437 = vmatprep.subr.bf16.mxu0 %v2852_v2  ;;  %v2919_v2 = vld [vmem:[#allocation2 + $0x34c] ss:$16 sps:$4 sm:$0xff]  }
  0x95   :  { %1520 = vmatpush1.bf16.msra.mxu1 %v2853_v6  ;;  %v3001_v6 = vld [vmem:[#allocation5 + $0x40] ss:$8 sps:$4 sm:$0xff]  }
  0x96   :  { %1438 = vmatpush1.bf16.msra.mxu0 %v2850_v5  ;;  %1521 = vmatprep.subr.bf16.mxu1 %v2861_v8  ;;  %v2917_v5 = vld [vmem:[#allocation2 + $0x348] ss:$16 sps:$4 sm:$0xff]   ;;  %v3006_v8 = vld [vmem:[#allocation5 + $0x54] ss:$8 sps:$4 sm:$0xff]  }
  0x97   :  { %1439 = vmatprep.subr.bf16.mxu0 %v2858_v7  ;;  %v2922_v7 = vld [vmem:[#allocation2 + $0x36c] ss:$16 sps:$4 sm:$0xff]  }
  0x99   :  { %1522 = vmatpush1.bf16.msra.mxu1 %v2859_v10  ;;  %v3004_v10 = vld [vmem:[#allocation5 + $0x50] ss:$8 sps:$4 sm:$0xff]  }
  0x9a   :  { %1440 = vmatpush1.bf16.msra.mxu0 %v2856_v9  ;;  %1523 = vmatprep.subr.bf16.mxu1 %v2867_v12  ;;  %v2920_v9 = vld [vmem:[#allocation2 + $0x368] ss:$16 sps:$4 sm:$0xff]   ;;  %v3009_v12 = vld [vmem:[#allocation5 + $0x64] ss:$8 sps:$4 sm:$0xff]  }
  0x9b   :  { %1441 = vmatprep.subr.bf16.mxu0 %v2864_v11  ;;  %v2925_v11 = vld [vmem:[#allocation2 + $0x38c] ss:$16 sps:$4 sm:$0xff]  }
  0x9d   :  { %1524 = vmatpush1.bf16.msra.mxu1 %v2865_v14  ;;  %v3007_v14 = vld [vmem:[#allocation5 + $0x60] ss:$8 sps:$4 sm:$0xff]  }
  0x9e   :  { %1442 = vmatpush1.bf16.msra.mxu0 %v2862_v13  ;;  %1525 = vmatprep.subr.bf16.mxu1 %v2873_v17  ;;  %v2923_v13 = vld [vmem:[#allocation2 + $0x388] ss:$16 sps:$4 sm:$0xff]   ;;  %v3012_v17 = vld [vmem:[#allocation5 + $0x74] ss:$8 sps:$4 sm:$0xff]  }
  0x9f   :  { %1443 = vmatprep.subr.bf16.mxu0 %v2870_v15  ;;  %v2928_v15 = vld [vmem:[#allocation2 + $0x3ac] ss:$16 sps:$4 sm:$0xff]  }
  0xa1   :  { %1526 = vmatpush1.bf16.msra.mxu1 %v2871_v20  ;;  %v3010_v20 = vld [vmem:[#allocation5 + $0x70] ss:$8 sps:$4 sm:$0xff]  }
  0xa2   :  { %1444 = vmatpush1.bf16.msra.mxu0 %v2868_v19  ;;  %1527 = vmatprep.subr.bf16.mxu1 %v2879_v22  ;;  %v2926_v19 = vld [vmem:[#allocation2 + $0x3a8] ss:$16 sps:$4 sm:$0xff]   ;;  %v3015_v22 = vld [vmem:[#allocation5 + $0x84] ss:$8 sps:$4 sm:$0xff]  }
  0xa3   :  { %1445 = vmatprep.subr.bf16.mxu0 %v2876_v21  ;;  %v2931_v21 = vld [vmem:[#allocation2 + $0x3cc] ss:$16 sps:$4 sm:$0xff]  }
  0xa5   :  { %1528 = vmatpush1.bf16.msra.mxu1 %v2877_v24  ;;  %v3013_v24 = vld [vmem:[#allocation5 + $0x80] ss:$8 sps:$4 sm:$0xff]  }
  0xa6   :  { %1446 = vmatpush1.bf16.msra.mxu0 %v2874_v23  ;;  %1538 = vmatprep.subr.bf16.mxu1 %v2883_v25  ;;  %v2929_v23 = vld [vmem:[#allocation2 + $0x3c8] ss:$16 sps:$4 sm:$0xff]   ;;  %v2934_v25 = vld [vmem:[#allocation2 + $0x3ec] ss:$16 sps:$4 sm:$0xff]  }
  0xa7   :  { %1456 = vmatprep.subr.bf16.mxu0 %v2886_v26  ;;  %v3018_v26 = vld [vmem:[#allocation5 + $0x94] ss:$8 sps:$4 sm:$0xff]  }
  0xa8   :  { %1530 = vmatmul.mubr.bf16.vlgmr.msra.gmra.mrb[4].mxu1 %v3259_v16  ;;  %v2896_v16 = vld [vmem:[#allocation2 + $0x268] ss:$16 sps:$4 sm:$0xff]  }
  0xa9   :  { %1448 = vmatmul.mubr.bf16.vlgmr.msra.gmra.mrb[0].mxu0 %v3281_v27  ;;  %1539 = vmatpush1.bf16.msra.mxu1 %v2881_v28  ;;  %v2932_v28 = vld [vmem:[#allocation2 + $0x3e8] ss:$16 sps:$4 sm:$0xff]  }
  0xaa   :  { %1457 = vmatpush1.bf16.msra.mxu0 %v2884_v29  ;;  %1540 = vmatprep.subr.bf16.mxu1 %v2889_v30  ;;  %v3016_v29 = vld [vmem:[#allocation5 + $0x90] ss:$8 sps:$4 sm:$0xff]   ;;  %v2937_v30 = vld [vmem:[#allocation2 + $0x40c] ss:$16 sps:$4 sm:$0xff]  }
  0xab   :  { %1458 = vmatprep.subr.bf16.mxu0 %v2892_v31  ;;  %1488 = vmatprep.mubr.bf16.mxu0 %v3180_v38  ;;  %v3021_v31 = vld [vmem:[#allocation5 + $0xa4] ss:$8 sps:$4 sm:$0xff]  }
  0xac   :  { %1570 = vmatprep.mubr.bf16.mxu1 %v3256_v3  ;;  %v2904_v3 = vld [vmem:[#allocation2 + $0x2ac] ss:$16 sps:$4 sm:$0xff]  }
  0xad   :  { %1541 = vmatpush1.bf16.msra.mxu1 %v2887_v33  ;;  %v2940_v33 = vld [vmem:[#allocation2 + $0x42c] ss:$16 sps:$4 sm:$0xff]  }
  0xae   :  { %1459 = vmatpush1.bf16.msra.mxu0 %v2890_v34  ;;  %1542 = vmatprep.subr.bf16.mxu1 %v2895_v35  ;;  %v3019_v34 = vld [vmem:[#allocation5 + $0xa0] ss:$8 sps:$4 sm:$0xff]   ;;  %v3024_v35 = vld [vmem:[#allocation5 + $0xb4] ss:$8 sps:$4 sm:$0xff]  }
  0xaf   :  { %1620 = vmatprep.subr.bf16.mxu0 %v2979_v36  ;;  %v2938_v36 = vld [vmem:[#allocation2 + $0x428] ss:$16 sps:$4 sm:$0xff]  }
  0xb1   :  { %1543 = vmatpush1.bf16.msra.mxu1 %v2893_v37  ;;  %v2943_v37 = vld [vmem:[#allocation2 + $0x44c] ss:$16 sps:$4 sm:$0xff]  }
  0xb2   :  { %1544 = vmatprep.subr.bf16.mxu1 %v2898_v40  ;;  %v2941_v40 = vld [vmem:[#allocation2 + $0x448] ss:$16 sps:$4 sm:$0xff]  }
  0xb5   :  { %2543 = vmatmul.mubr.msk.bf16.vlgmr.msra.gmra.mrb[0].mxu0 %vm1329_vm0, %v106_v42  ;;  %1545 = vmatpush1.bf16.msra.mxu1 %v2896_v16  ;;  %v2946_v16 = vld [vmem:[#allocation2 + $0x46c] ss:$16 sps:$4 sm:$0xff]  }
  0xb6   :  { %1621 = vmatpush1.bf16.msra.mxu0 %v2977_v41  ;;  %1546 = vmatprep.subr.bf16.mxu1 %v2901_v44  ;;  %v3025_v41 = vld [vmem:[#allocation5 + $0xc0] ss:$8 sps:$4 sm:$0xff]   ;;  %v2949_v44 = vld [vmem:[#allocation2 + $0x48c] ss:$16 sps:$4 sm:$0xff]  }
  0xb7   :  { %1622 = vmatprep.subr.bf16.mxu0 %v2985_v45  ;;  %1652 = vmatprep.mubr.bf16.mxu0 %v3180_v38  ;;  %v3022_v38 = vld [vmem:[#allocation5 + $0xb0] ss:$8 sps:$4 sm:$0xff]  }
  0xb8   :  { %v2947_v45 = vld [vmem:[#allocation2 + $0x488] ss:$16 sps:$4 sm:$0xff]  }
  0xb9   :  { %1547 = vmatpush1.bf16.msra.mxu1 %v2899_v46  ;;  %v2952_v46 = vld [vmem:[#allocation2 + $0x4ac] ss:$16 sps:$4 sm:$0xff]  }
  0xba   :  { %1623 = vmatpush1.bf16.msra.mxu0 %v2983_v47  ;;  %1548 = vmatprep.subr.bf16.mxu1 %v2904_v3  ;;  %v2950_v47 = vld [vmem:[#allocation2 + $0x4a8] ss:$16 sps:$4 sm:$0xff]   ;;  %v2955_v3 = vld [vmem:[#allocation2 + $0x4cc] ss:$16 sps:$4 sm:$0xff]  }
  0xbb   :  { %2065 = vmatprep.subr.bf16.mxu0 %v2991_v54  ;;  %v2964_v54 = vld [vmem:[#allocation2 + $0x52c] ss:$16 sps:$4 sm:$0xff]  }
  0xbd   :  { %2544 = vmatmul.mubr.msk.bf16.vlgmr.msra.gmra.mrb[4].mxu0 %vm1329_vm0, %v106_v42  ;;  %1549 = vmatpush1.bf16.msra.mxu1 %v2902_v49  ;;  %v3030_v42 = vld [vmem:[#allocation5 + $0xd4] ss:$8 sps:$4 sm:$0xff]   ;;  %v2953_v49 = vld [vmem:[#allocation2 + $0x4c8] ss:$16 sps:$4 sm:$0xff]  }
  0xbe   :  { %1550 = vmatprep.subr.bf16.mxu1 %v2907_v48  ;;  %2066 = vmatpush1.bf16.msra.mxu0 %v2989_v53  ;;  %v2958_v48 = vld [vmem:[#allocation2 + $0x4ec] ss:$16 sps:$4 sm:$0xff]   ;;  %v2959_v53 = vld [vmem:[#allocation2 + $0x508] ss:$16 sps:$4 sm:$0xff]  }
  0xbf   :  { %2067 = vmatprep.subr.bf16.mxu0 %v2994_v55  ;;  %v3033_v55 = vld [vmem:[#allocation5 + $0xe4] ss:$8 sps:$4 sm:$0xff]  }
  0xc1   :  { %1551 = vmatpush1.bf16.msra.mxu1 %v2905_v50  ;;  %v2956_v50 = vld [vmem:[#allocation2 + $0x4e8] ss:$16 sps:$4 sm:$0xff]  }
  0xc2   :  { %1552 = vmatprep.subr.bf16.mxu1 %v2910_v52  ;;  %2068 = vmatpush1.bf16.msra.mxu0 %v2992_v57  ;;  %v2961_v52 = vld [vmem:[#allocation2 + $0x50c] ss:$16 sps:$4 sm:$0xff]   ;;  %v2962_v57 = vld [vmem:[#allocation2 + $0x528] ss:$16 sps:$4 sm:$0xff]  }
  0xc3   :  { %2069 = vmatprep.subr.bf16.mxu0 %v2997_v59  ;;  %v3036_v59 = vld [vmem:[#allocation5 + $0xf4] ss:$8 sps:$4 sm:$0xff]  }
  0xc5   :  { %1553 = vmatpush1.bf16.msra.mxu1 %v2908_v56  ;;  %v3031_v56 = vld [vmem:[#allocation5 + $0xe0] ss:$8 sps:$4 sm:$0xff]  }
  0xc6   :  { %1554 = vmatprep.subr.bf16.mxu1 %v2913_v58  ;;  %2070 = vmatpush1.bf16.msra.mxu0 %v2995_v61  ;;  %v2967_v58 = vld [vmem:[#allocation2 + $0x54c] ss:$16 sps:$4 sm:$0xff]   ;;  %v2965_v61 = vld [vmem:[#allocation2 + $0x548] ss:$16 sps:$4 sm:$0xff]  }
  0xc7   :  { %2071 = vmatprep.subr.bf16.mxu0 %v3000_v63  ;;  %v3039_v63 = vld [vmem:[#allocation5 + $0x104] ss:$8 sps:$4 sm:$0xff]  }
  0xc9   :  { %1555 = vmatpush1.bf16.msra.mxu1 %v2911_v60  ;;  %v3034_v60 = vld [vmem:[#allocation5 + $0xf0] ss:$8 sps:$4 sm:$0xff]  }
  0xca   :  { %1556 = vmatprep.subr.bf16.mxu1 %v2916_v62  ;;  %2072 = vmatpush1.bf16.msra.mxu0 %v2998_v1  ;;  %v2970_v62 = vld [vmem:[#allocation2 + $0x56c] ss:$16 sps:$4 sm:$0xff]  }
  0xcb   :  { %2073 = vmatprep.subr.bf16.mxu0 %v3003_v4  ;;  %v2973_v1 = vld [vmem:[#allocation2 + $0x58c] ss:$16 sps:$4 sm:$0xff]  }
  0xcc   :  { %v2976_v4 = vld [vmem:[#allocation2 + $0x5ac] ss:$16 sps:$4 sm:$0xff]  }
  0xcd   :  { %1557 = vmatpush1.bf16.msra.mxu1 %v2914_v0  ;;  %v2968_v0 = vld [vmem:[#allocation2 + $0x568] ss:$16 sps:$4 sm:$0xff]  }
  0xce   :  { %1558 = vmatprep.subr.bf16.mxu1 %v2919_v2  ;;  %2074 = vmatpush1.bf16.msra.mxu0 %v3001_v6  ;;  %v2971_v2 = vld [vmem:[#allocation2 + $0x588] ss:$16 sps:$4 sm:$0xff]   ;;  %v2982_v6 = vld [vmem:[#allocation2 + $0x5cc] ss:$16 sps:$4 sm:$0xff]  }
  0xcf   :  { %2075 = vmatprep.subr.bf16.mxu0 %v3006_v8  ;;  %v2988_v8 = vld [vmem:[#allocation2 + $0x5ec] ss:$16 sps:$4 sm:$0xff]  }
  0xd1   :  { %1559 = vmatpush1.bf16.msra.mxu1 %v2917_v5  ;;  %v2974_v5 = vld [vmem:[#allocation2 + $0x5a8] ss:$16 sps:$4 sm:$0xff]  }
  0xd2   :  { %1560 = vmatprep.subr.bf16.mxu1 %v2922_v7  ;;  %2076 = vmatpush1.bf16.msra.mxu0 %v3004_v10  ;;  %v2980_v7 = vld [vmem:[#allocation2 + $0x5c8] ss:$16 sps:$4 sm:$0xff]  }
  0xd3   :  { %2077 = vmatprep.subr.bf16.mxu0 %v3009_v12 }
  0xd5   :  { %1561 = vmatpush1.bf16.msra.mxu1 %v2920_v9  ;;  %v2986_v9 = vld [vmem:[#allocation2 + $0x5e8] ss:$16 sps:$4 sm:$0xff]  }
  0xd6   :  { %1562 = vmatprep.subr.bf16.mxu1 %v2925_v11  ;;  %2078 = vmatpush1.bf16.msra.mxu0 %v3007_v14  ;;  %v311_v14 = vsub.s32 0, %v3246_v43 }
  0xd7   :  { %2079 = vmatprep.subr.bf16.mxu0 %v3012_v17  ;;  %v315_v17 = vsub.s32 1, %v3246_v43 }
  0xd9   :  { %1563 = vmatpush1.bf16.msra.mxu1 %v2923_v13 }
  0xda   :  { %1564 = vmatprep.subr.bf16.mxu1 %v2928_v15  ;;  %2080 = vmatpush1.bf16.msra.mxu0 %v3010_v20  ;;  %v3298_v15 = vld [vmem:[%s3389_s2] sm:$0xf] }
  0xdb   :  { %2081 = vmatprep.subr.bf16.mxu0 %v3015_v22  ;;  %v3086_v22 = vld [vmem:[%s3392_s5] sm:$0xff]  }
  0xdd   :  { %1565 = vmatpush1.bf16.msra.mxu1 %v2926_v19  ;;  %v312_v19 = vrot.slane %v3298_v15, %v311_v14 }
  0xde   :  { %1566 = vmatprep.subr.bf16.mxu1 %v2931_v21  ;;  %2082 = vmatpush1.bf16.msra.mxu0 %v3013_v24  ;;  %v3085_v21 = vld [vmem:[%s3392_s5 + $0x40] sm:$0xff]  }
  0xdf   :  { %2083 = vmatprep.subr.bf16.mxu0 %v3018_v26 }
  0xe1   :  { %1567 = vmatpush1.bf16.msra.mxu1 %v2929_v23  ;;  %v3087_v23 = vld [vmem:[%s3392_s5 + $0x48] sm:$0xff]  }
  0xe2   :  { %1568 = vmatprep.subr.bf16.mxu1 %v2934_v25  ;;  %2084 = vmatpush1.bf16.msra.mxu0 %v3016_v29 }
  0xe3   :  { %2085 = vmatprep.subr.bf16.mxu0 %v3021_v31  ;;  %v3088_v31 = vld [vmem:[%s3392_s5 + $0x8] sm:$0xff]  }
  0xe5   :  { %1569 = vmatpush1.bf16.msra.mxu1 %v2932_v28 }
  0xe6   :  { %1579 = vmatprep.subr.bf16.mxu1 %v2937_v30  ;;  %2086 = vmatpush1.bf16.msra.mxu0 %v3019_v34  ;;  %v3089_v34 = vld [vmem:[%s3392_s5 + $0x50] sm:$0xff]  }
  0xe7   :  { %2087 = vmatprep.subr.bf16.mxu0 %v3024_v35 }
  0xe8   :  { %1571 = vmatmul.mubr.bf16.vlgmr.msra.gmra.mrb[4].mxu1 %v3261_v18  ;;  %v2944_v18 = vld [vmem:[#allocation2 + $0x468] ss:$16 sps:$4 sm:$0xff]  }
  0xe9   :  { %1580 = vmatpush1.bf16.msra.mxu1 %v2935_v32  ;;  %1611 = vmatprep.mubr.bf16.mxu1 %v3276_v51  ;;  %v3028_v51 = vld [vmem:[#allocation5 + $0xd0] ss:$8 sps:$4 sm:$0xff]  }
  0xea   :  { %1581 = vmatprep.subr.bf16.mxu1 %v2940_v33  ;;  %2088 = vmatpush1.bf16.msra.mxu0 %v3022_v38  ;;  %v3090_v38 = vld [vmem:[%s3392_s5 + $0x10] sm:$0xff]  }
  0xeb   :  { %2089 = vmatprep.subr.bf16.mxu0 %v3027_v39 }
  0xed   :  { %1582 = vmatpush1.bf16.msra.mxu1 %v2938_v36 }
  0xee   :  { %1583 = vmatprep.subr.bf16.mxu1 %v2943_v37  ;;  %2090 = vmatpush1.bf16.msra.mxu0 %v3025_v41  ;;  %v3037_v37 = vld [vmem:[#allocation5 + $0x100] ss:$8 sps:$4 sm:$0xff]  }
  0xef   :  { %2091 = vmatprep.subr.bf16.mxu0 %v3030_v42 }
  0xf1   :  { %1584 = vmatpush1.bf16.msra.mxu1 %v2941_v40  ;;  %v3042_v40 = vld [vmem:[#allocation5 + $0x114] ss:$8 sps:$4 sm:$0xff]  }
  0xf2   :  { %1585 = vmatprep.subr.bf16.mxu1 %v2946_v16  ;;  %2092 = vmatpush1.bf16.msra.mxu0 %v3028_v51  ;;  %v3091_v16 = vld [vmem:[%s3392_s5 + $0x58] sm:$0xff]  }
  0xf3   :  { %2093 = vmatprep.subr.bf16.mxu0 %v3033_v55  ;;  %v3092_v51 = vld [vmem:[%s3392_s5 + $0x18] sm:$0xff]   ;;  %v3049_v55 = vld [vmem:[#allocation5 + $0x140] ss:$8 sps:$4 sm:$0xff]  }
  0xf5   :  { %1586 = vmatpush1.bf16.msra.mxu1 %v2944_v18  ;;  %v3040_v18 = vld [vmem:[#allocation5 + $0x110] ss:$8 sps:$4 sm:$0xff]  }
  0xf6   :  { %1587 = vmatprep.subr.bf16.mxu1 %v2949_v44  ;;  %2094 = vmatpush1.bf16.msra.mxu0 %v3031_v56  ;;  %v3054_v56 = vld [vmem:[#allocation5 + $0x154] ss:$8 sps:$4 sm:$0xff]  }
  0xf7   :  { %2095 = vmatprep.subr.bf16.mxu0 %v3036_v59  ;;  %v3055_v59 = vld [vmem:[#allocation5 + $0x160] ss:$8 sps:$4 sm:$0xff]  }
  0xf9   :  { %1588 = vmatpush1.bf16.msra.mxu1 %v2947_v45  ;;  %v3045_v45 = vld [vmem:[#allocation5 + $0x124] ss:$8 sps:$4 sm:$0xff]  }
  0xfa   :  { %1589 = vmatprep.subr.bf16.mxu1 %v2952_v46  ;;  %2096 = vmatpush1.bf16.msra.mxu0 %v3034_v60  ;;  %v3060_v60 = vld [vmem:[#allocation5 + $0x174] ss:$8 sps:$4 sm:$0xff]  }
  0xfb   :  { %2106 = vmatprep.subr.bf16.mxu0 %v3039_v63  ;;  %v3061_v63 = vld [vmem:[#allocation5 + $0x180] ss:$8 sps:$4 sm:$0xff]  }
  0xfd   :  { %1590 = vmatpush1.bf16.msra.mxu1 %v2950_v47  ;;  %v3093_v47 = vld [vmem:[%s3392_s5 + $0x60] sm:$0xff]  }
  0xfe   :  { %1591 = vmatprep.subr.bf16.mxu1 %v2955_v3  ;;  %v3043_v3 = vld [vmem:[#allocation5 + $0x120] ss:$8 sps:$4 sm:$0xff]  }
 0x101   :  { %1592 = vmatpush1.bf16.msra.mxu1 %v2953_v49  ;;  %v3094_v49 = vld [vmem:[%s3392_s5 + $0x20] sm:$0xff]  }
 0x102   :  { %1593 = vmatprep.subr.bf16.mxu1 %v2958_v48  ;;  %v3048_v48 = vld [vmem:[#allocation5 + $0x134] ss:$8 sps:$4 sm:$0xff]  }
 0x105   :  { %1594 = vmatpush1.bf16.msra.mxu1 %v2956_v50  ;;  %v3095_v50 = vld [vmem:[%s3392_s5 + $0x68] sm:$0xff]  }
 0x106   :  { %1595 = vmatprep.subr.bf16.mxu1 %v2961_v52  ;;  %v3046_v52 = vld [vmem:[#allocation5 + $0x130] ss:$8 sps:$4 sm:$0xff]  }
 0x109   :  { %1596 = vmatpush1.bf16.msra.mxu1 %v2959_v53  ;;  %v3096_v53 = vld [vmem:[%s3392_s5 + $0x28] sm:$0xff]  }
 0x10a   :  { %1597 = vmatprep.subr.bf16.mxu1 %v2964_v54  ;;  %v3051_v54 = vld [vmem:[#allocation5 + $0x144] ss:$8 sps:$4 sm:$0xff]  }
 0x10d   :  { %1598 = vmatpush1.bf16.msra.mxu1 %v2962_v57  ;;  %v3052_v57 = vld [vmem:[#allocation5 + $0x150] ss:$8 sps:$4 sm:$0xff]  }
 0x10e   :  { %1599 = vmatprep.subr.bf16.mxu1 %v2967_v58  ;;  %v3057_v58 = vld [vmem:[#allocation5 + $0x164] ss:$8 sps:$4 sm:$0xff]  }
 0x111   :  { %1600 = vmatpush1.bf16.msra.mxu1 %v2965_v61  ;;  %v3058_v61 = vld [vmem:[#allocation5 + $0x170] ss:$8 sps:$4 sm:$0xff]  }
 0x112   :  { %1601 = vmatprep.subr.bf16.mxu1 %v2970_v62  ;;  %v3063_v62 = vld [vmem:[#allocation5 + $0x184] ss:$8 sps:$4 sm:$0xff]  }
 0x115   :  { %1602 = vmatpush1.bf16.msra.mxu1 %v2968_v0  ;;  %v3066_v0 = vld [vmem:[#allocation5 + $0x194] ss:$8 sps:$4 sm:$0xff]  }
 0x116   :  { %1603 = vmatprep.subr.bf16.mxu1 %v2973_v1  ;;  %v3064_v1 = vld [vmem:[#allocation5 + $0x190] ss:$8 sps:$4 sm:$0xff]  }
 0x119   :  { %1604 = vmatpush1.bf16.msra.mxu1 %v2971_v2  ;;  %v3069_v2 = vld [vmem:[#allocation5 + $0x1a4] ss:$8 sps:$4 sm:$0xff]  }
 0x11a   :  { %1605 = vmatprep.subr.bf16.mxu1 %v2976_v4  ;;  %v3067_v4 = vld [vmem:[#allocation5 + $0x1a0] ss:$8 sps:$4 sm:$0xff]  }
 0x11d   :  { %1606 = vmatpush1.bf16.msra.mxu1 %v2974_v5  ;;  %v3072_v5 = vld [vmem:[#allocation5 + $0x1b4] ss:$8 sps:$4 sm:$0xff]  }
 0x11e   :  { %1607 = vmatprep.subr.bf16.mxu1 %v2982_v6  ;;  %v3070_v6 = vld [vmem:[#allocation5 + $0x1b0] ss:$8 sps:$4 sm:$0xff]  }
 0x121   :  { %1608 = vmatpush1.bf16.msra.mxu1 %v2980_v7  ;;  %v3075_v7 = vld [vmem:[#allocation5 + $0x1c4] ss:$8 sps:$4 sm:$0xff]  }
 0x122   :  { %1609 = vmatprep.subr.bf16.mxu1 %v2988_v8  ;;  %v3073_v8 = vld [vmem:[#allocation5 + $0x1c0] ss:$8 sps:$4 sm:$0xff]  }
 0x125   :  { %1610 = vmatpush1.bf16.msra.mxu1 %v2986_v9  ;;  %v3078_v9 = vld [vmem:[#allocation5 + $0x1d4] ss:$8 sps:$4 sm:$0xff]  }
 0x126   :  { %2626 = vmatprep.subr.bf16.mxu1 %v3085_v21 }
 0x128   :  { %1612 = vmatmul.mubr.bf16.vlgmr.msra.gmra.mrb[4].mxu1 %v3281_v27  ;;  %v316_v27 = vrot.slane %v3298_v15, %v315_v17 }
 0x129   :  { %2627 = vmatpush3.bf16.msra.mxu1 %v3086_v22 }
 0x12a   :  { %2628 = vmatprep.subr.bf16.mxu1 %v3087_v23 }
 0x12d   :  { %2629 = vmatpush3.bf16.msra.mxu1 %v3088_v31 }
 0x12e   :  { %2630 = vmatprep.subr.bf16.mxu1 %v3089_v34 }
 0x131   :  { %2631 = vmatpush3.bf16.msra.mxu1 %v3090_v38  ;;  %v3100_v38 = vld [vmem:[%s3392_s5 + $0x38] sm:$0xff]  }
 0x132   :  { %2632 = vmatprep.subr.bf16.mxu1 %v3091_v16 }
 0x135   :  { %2633 = vmatpush3.bf16.msra.mxu1 %v3092_v51 }
 0x136   :  { %2634 = vmatprep.subr.bf16.mxu1 %v3093_v47 }
 0x139   :  { %2635 = vmatpush3.bf16.msra.mxu1 %v3094_v49 }
 0x13a   :  { %2636 = vmatprep.subr.bf16.mxu1 %v3095_v50 }
 0x13b   :  { %v1367_v10 = vpop.f32.mrb[0].mxu1 }
 0x13c   :  { %v1369_v11 = vpop.f32.mrb[1].mxu1  ;;  %v1368_v20 = vadd.f32 %v1367_v10, %v312_v19  ;;  %v3076_v10 = vld [vmem:[#allocation5 + $0x1d0] ss:$8 sps:$4 sm:$0xff]  }
 0x13d   :  { %v1371_v12 = vpop.f32.mrb[2].mxu1  ;;  %v1370_v24 = vadd.f32 %v1369_v11, %v316_v27  ;;  %2637 = vmatpush3.bf16.msra.mxu1 %v3096_v53  ;;  %v3081_v11 = vld [vmem:[#allocation5 + $0x1e4] ss:$8 sps:$4 sm:$0xff]   ;;  %v3082_v19 = vld [vmem:[#allocation5 + $0x1f0] ss:$8 sps:$4 sm:$0xff]   ;;  %v319_v27 = vsub.s32 2, %v3246_v43 }
 0x13e   :  { %v1372_v13 = vpop.f32.mrb[3].mxu1  ;;  %v3079_v12 = vld [vmem:[#allocation5 + $0x1e0] ss:$8 sps:$4 sm:$0xff]  }
 0x13f   :  { %v3084_v13 = vld [vmem:[#allocation5 + $0x1f4] ss:$8 sps:$4 sm:$0xff]   ;;  %v320_v21 = vrot.slane %v3298_v15, %v319_v27 }
 0x188   :  { %v1490_v25 = vpop.f32.mrb[0].mxu0 }
 0x189   :  { %v2649_v26 = vadd.f32 %v1490_v25, %v1368_v20  ;;  %v1492_v28 = vpop.f32.mrb[1].mxu0  ;;  %v323_v20 = vsub.s32 3, %v3246_v43 }
 0x18a   :  { %v2651_v29 = vadd.f32 %v1492_v28, %v1370_v24  ;;  %v1494_v30 = vpop.f32.mrb[2].mxu0 }
 0x18b   :  { %v1661_v32 = vmax.f32 %v2649_v26, 0.0  ;;  %v1495_v33 = vpop.f32.mrb[3].mxu0  ;;  %v324_v22 = vrot.slane %v3298_v15, %v323_v20  ;;  %v3097_v15 = vld [vmem:[%s3392_s5 + $0x70] sm:$0xff]  }
 0x18c   :  { %v1662_v35 = vmax.f32 %v2651_v29, 0.0  ;;  %2638 = vmatprep.subr.bf16.mxu1 %v3097_v15 }
 0x18d   :  { %v1665_v39 = vpack.c.bf16 %v1661_v32, %v1661_v32 }
 0x18e   :  { %v1666_v36 = vpack.c.bf16 %v1662_v35, %v1662_v35 }
 0x190   :  { %2097 = vmatprep.mubr.bf16.mxu0 %v1666_v36  ;;  %v3328_v41 = vpop.f32.mrb[4].mxu0  ;;  %v3098_v36 = vld [vmem:[%s3392_s5 + $0x30] sm:$0xff]  }
 0x191   :  { %2098 = vmatmul.mubr.bf16.vlgmr.msra.gmra.mrb[8].mxu0 %v1665_v39  ;;  %v3330_v42 = vpop.f32.mrb[5].mxu0  ;;  %2639 = vmatpush3.bf16.msra.mxu1 %v3098_v36  ;;  %v1733_v39 = vld [vmem:[%s3391_s4] sm:$0x3] }
 0x192   :  { %2107 = vmatpush1.bf16.msra.mxu0 %v3037_v37  ;;  %v1658_v44 = vpop.f32.mrb[6].mxu0  ;;  %v3099_v37 = vld [vmem:[%s3392_s5 + $0x78] sm:$0xff]   ;;  %v1742_v16 = vrot.slane %v1733_v39, %v315_v17 }
 0x193   :  { %2108 = vmatprep.subr.bf16.mxu0 %v3042_v40  ;;  %v1659_v46 = vpop.f32.mrb[7].mxu0  ;;  %2640 = vmatprep.subr.bf16.mxu1 %v3099_v37  ;;  %v1738_v40 = vrot.slane %v1733_v39, %v311_v14  ;;  %v2609_v14 = vld [vmem:[%s3393_s6] ss:$0 sm:$0xff] }
 0x195   :  { %2641 = vmatpush3.bf16.msra.mxu1 %v3100_v38 }
 0x196   :  { %2109 = vmatpush1.bf16.msra.mxu0 %v3040_v18 }
 0x197   :  { %2110 = vmatprep.subr.bf16.mxu0 %v3045_v45 }
 0x19a   :  { %2111 = vmatpush1.bf16.msra.mxu0 %v3043_v3 }
 0x19b   :  { %2112 = vmatprep.subr.bf16.mxu0 %v3048_v48 }
 0x19e   :  { %2113 = vmatpush1.bf16.msra.mxu0 %v3046_v52 }
 0x19f   :  { %2114 = vmatprep.subr.bf16.mxu0 %v3051_v54 }
 0x1a2   :  { %2115 = vmatpush1.bf16.msra.mxu0 %v3049_v55 }
 0x1a3   :  { %2116 = vmatprep.subr.bf16.mxu0 %v3054_v56 }
 0x1a6   :  { %2117 = vmatpush1.bf16.msra.mxu0 %v3052_v57 }
 0x1a7   :  { %2118 = vmatprep.subr.bf16.mxu0 %v3057_v58 }
 0x1aa   :  { %2119 = vmatpush1.bf16.msra.mxu0 %v3055_v59 }
 0x1ab   :  { %2120 = vmatprep.subr.bf16.mxu0 %v3060_v60 }
 0x1ae   :  { %2121 = vmatpush1.bf16.msra.mxu0 %v3058_v61 }
 0x1af   :  { %2122 = vmatprep.subr.bf16.mxu0 %v3063_v62 }
 0x1b2   :  { %2123 = vmatpush1.bf16.msra.mxu0 %v3061_v63 }
 0x1b3   :  { %2124 = vmatprep.subr.bf16.mxu0 %v3066_v0 }
 0x1b6   :  { %2125 = vmatpush1.bf16.msra.mxu0 %v3064_v1 }
 0x1b7   :  { %2126 = vmatprep.subr.bf16.mxu0 %v3069_v2 }
 0x1ba   :  { %2127 = vmatpush1.bf16.msra.mxu0 %v3067_v4 }
 0x1bb   :  { %2128 = vmatprep.subr.bf16.mxu0 %v3072_v5 }
 0x1be   :  { %2129 = vmatpush1.bf16.msra.mxu0 %v3070_v6 }
 0x1bf   :  { %2130 = vmatprep.subr.bf16.mxu0 %v3075_v7 }
 0x1c2   :  { %2131 = vmatpush1.bf16.msra.mxu0 %v3073_v8 }
 0x1c3   :  { %2132 = vmatprep.subr.bf16.mxu0 %v3078_v9 }
 0x1c6   :  { %2133 = vmatpush1.bf16.msra.mxu0 %v3076_v10 }
 0x1c7   :  { %2134 = vmatprep.subr.bf16.mxu0 %v3081_v11 }
 0x1ca   :  { %2135 = vmatpush1.bf16.msra.mxu0 %v3079_v12 }
 0x1cb   :  { %2136 = vmatprep.subr.bf16.mxu0 %v3084_v13 }
 0x1ce   :  { %2137 = vmatpush1.bf16.msra.mxu0 %v3082_v19 }
 0x1fb   :  { %v1613_v23 = vpop.f32.mrb[4].mxu1 }
 0x1fc   :  { %v2652_v24 = vadd.f32 %v1613_v23, %v320_v21  ;;  %v1615_v25 = vpop.f32.mrb[5].mxu1 }
 0x1fd   :  { %v2654_v26 = vadd.f32 %v1615_v25, %v324_v22  ;;  %v1617_v28 = vpop.f32.mrb[6].mxu1 }
 0x1fe   :  { %v2653_v29 = vadd.f32 %v2652_v24, %v3328_v41  ;;  %v1618_v30 = vpop.f32.mrb[7].mxu1 }
 0x1ff   :  { %v2655_v31 = vadd.f32 %v2654_v26, %v3330_v42 }
 0x200   :  { %v1663_v32 = vmax.f32 %v2653_v29, 0.0 }
 0x201   :  { %v1664_v33 = vmax.f32 %v2655_v31, 0.0 }
 0x202   :  { %v1667_v35 = vpack.c.bf16 %v1663_v32, %v1663_v32 }
 0x203   :  { %v1668_v34 = vpack.c.bf16 %v1664_v33, %v1664_v33 }
 0x205   :  { %2138 = vmatprep.mubr.bf16.mxu0 %v1668_v34 }
 0x206   :  { %2139 = vmatmul.mubr.bf16.vlgmr.msra.gmra.mrb[8].mxu0 %v1667_v35 }
 0x2d9   :  { %v2140_v41 = vpop.f32.mrb[8].mxu0 }
 0x2da   :  { %v2656_v42 = vadd.f32 %v2140_v41, %v1738_v40  ;;  %v2142_v18 = vpop.f32.mrb[9].mxu0 }
 0x2db   :  { %v2657_v44 = vadd.f32 %v2142_v18, %v1742_v16  ;;  %v2144_v51 = vpop.f32.mrb[10].mxu0 }
 0x2dc   :  { %v2147_v45 = vmax.f32 %v2656_v42, 0.0  ;;  %v2145_v46 = vpop.f32.mrb[11].mxu0 }
 0x2dd   :  { %v2148_v47 = vmax.f32 %v2657_v44, 0.0 }
 0x2de   :  { %v2149_v49 = vpack.c.bf16 %v2147_v45, %v2147_v45 }
 0x2df   :  { %v2150_v3 = vpack.c.bf16 %v2148_v47, %v2148_v47 }
 0x2e1   :  { %2318 = vmatprep.mubr.bf16.mxu1 %v2150_v3 }
 0x2e2   :  { %2319 = vmatmul.mubr.bf16.vlgmr.msra.gmra.mrb[8].mxu1 %v2149_v49 }
 0x3b5   :  { %v2642_v48 = vpop.f32.mrb[8].mxu1 }
 0x3b6   :  { %v2643_v50 = vpop.f32.mrb[9].mxu1 }
 0x3b7   :  { %v2644_v43 = vadd.f32 %v2643_v50, %v2642_v48  ;;  %v2645_v17 = vpop.f32.mrb[10].mxu1 }
 0x3b8   :  { %v2646_v52 = vpop.f32.mrb[11].mxu1 }
 0x3b9   :  { %v2321_v53 = vadd.f32 %v2644_v43, %v2609_v14 }
 0x3bb   :  { %2326 = vst [vmem:[#allocation7] sm:$0x3] %v2321_v53 }
 0x3bc   :  { %3156 = shalt.err (!%p3153_p6)
}
 0x3bd   :  { %s3157_s6 = scalar_lea.hbm %s3394_s7, 32 }
 0x3be   :  { %p3158_p7 = scmp.ne.s32.totalorder %s3394_s7, %s3157_s6  ;;  %p3161_p8 = scmp.lt.u32.totalorder %s3157_s6, %s3394_s7 }
 0x3c0   :  { %p3163_p9 = pnand %p3161_p8, %p3158_p7 }
 0x3c2   :  { %3166 = shalt.err (!%p3163_p9)
}
 0x3c3   :  { %2336 = dma.vmem_to_hbm [thread:$0]  %s2334_s16, 32, %s3394_s7, [#allocation4]  }
 0x3c4   :  { %3171 = dma.done.wait [#allocation4], 32  }
 0x3c5   :  { %3172 = vsyncadd [#allocation4], 4294967264 }
 0x3c6   :  { %2340 = vsyncpa [#allocation3], 1 }
 0x3c7   :  { %2341 = vsyncpa [#allocation6], 1 }
 0x3c8   :  { %2342 = vsyncpa [#allocation4], 1 }

</bundles_post_ra>
